<compile_context>
chip_gen: v6e
topology: v6e:2x2x1
jax: 0.10.0
libtpu: 0.0.40
codegen_flags: <defaults>
</compile_context>

<pallas_src>
import functools

import jax
import jax.numpy as jnp
from jax.experimental import pallas as pl
from jax.experimental.pallas import tpu as pltpu


def gcn_kernel(a_ref, x_ref,
               w1_ref, b1_ref, w2_ref, b2_ref, w3_ref, b3_ref, w4_ref, b4_ref,
               pool_ref, lw_ref, lb_ref, out_ref):
    a = a_ref[...]                                    # bf16 [N, N]

    def mm(lhs, rhs):
        # MXU matmul: bf16 operands, f32 accumulation.
        return jnp.dot(lhs.astype(jnp.bfloat16), rhs.astype(jnp.bfloat16),
                       preferred_element_type=jnp.float32)

    # conv1: F_in < F_out, so re-associate as (A @ X) @ W1 (smaller N^2 term).
    h = jnp.maximum(mm(mm(a, x_ref[...]), w1_ref[...]) + b1_ref[...], 0.0)

    def hidden_layer(h, w_ref, b_ref):
        # Square hidden layers: A @ (H W) + b. Bias add / ReLU stay f32 (VPU).
        return mm(a, mm(h, w_ref[...])) + b_ref[...]

    h = jnp.maximum(hidden_layer(h, w2_ref, b2_ref), 0.0)   # conv2 + relu
    h = jnp.maximum(hidden_layer(h, w3_ref, b3_ref), 0.0)   # conv3 + relu
    h = hidden_layer(h, w4_ref, b4_ref)                     # conv4 (no relu, matches module)

    pooled = mm(pool_ref[...], h)                            # global_mean_pool
    # F.dropout(p=0.5) is identity in inference mode (no mask, no scale).
    out_ref[...] = mm(pooled, lw_ref[...]) + lb_ref[...]


def build_norm_adj(edge_index, num_nodes):
    """Dense D^-1/2 (A + I) D^-1/2 as used by PyG GCNConv (add_self_loops=True).

    Uses scatter-add so duplicate edges accumulate like PyG's scatter does."""
    src, dst = edge_index[0], edge_index[1]
    a = jnp.zeros((num_nodes, num_nodes), jnp.float32).at[dst, src].add(1.0)
    a = a + jnp.eye(num_nodes, dtype=jnp.float32)
    deg = a.sum(axis=1)
    dinv = jnp.where(deg > 0, 1.0 / jnp.sqrt(deg), 0.0)
    return dinv[:, None] * a * dinv[None, :]


def build_mean_pool(batch, num_graphs, num_nodes):
    onehot = (batch[None, :] == jnp.arange(num_graphs)[:, None]).astype(jnp.float32)  # [G, N]
    counts = onehot.sum(axis=1, keepdims=True)
    return onehot / jnp.maximum(counts, 1.0)


@functools.partial(jax.jit, static_argnames=("num_graphs",))
def gcn_forward(x, edge_index, batch, params, *, num_graphs):
    n = x.shape[0]
    # Preprocessing fused into the same jit as the kernel call (no per-op dispatch).
    a_norm = build_norm_adj(edge_index, n).astype(jnp.bfloat16)
    pool = build_mean_pool(batch, num_graphs, n).astype(jnp.bfloat16)
    num_classes = params["lin_w_t"].shape[1]

    bf16 = lambda t: t.astype(jnp.bfloat16)
    args = (a_norm, bf16(x),
            bf16(params["w1"]), params["b1"],
            bf16(params["w2"]), params["b2"],
            bf16(params["w3"]), params["b3"],
            bf16(params["w4"]), params["b4"],
            pool, bf16(params["lin_w_t"]), params["lin_b"])

    vmem = pl.BlockSpec(memory_space=pltpu.MemorySpace.VMEM)
    return pl.pallas_call(
        gcn_kernel,
        out_shape=jax.ShapeDtypeStruct((num_graphs, num_classes), jnp.float32),
        in_specs=[vmem] * len(args),
        out_specs=vmem,
    )(*args)


def gcn_reference_f32(x, edge_index, batch, params, num_graphs):
    """Pure-JAX f32 reference (same math, full precision) for validation."""
    n = x.shape[0]
    a = build_norm_adj(edge_index, n)
    pool = build_mean_pool(batch, num_graphs, n)
    h = jnp.maximum(a @ (x @ params["w1"]) + params["b1"], 0.0)
    h = jnp.maximum(a @ (h @ params["w2"]) + params["b2"], 0.0)
    h = jnp.maximum(a @ (h @ params["w3"]) + params["b3"], 0.0)
    h = a @ (h @ params["w4"]) + params["b4"]
    return (pool @ h) @ params["lin_w_t"] + params["lin_b"]


def init_params(key, node_feature_dim, hidden, num_classes):
    """Deterministic glorot-uniform-style init (shapes match the torch module)."""
    def glorot(k, shape):
        fan_in, fan_out = shape[0], shape[1]
        limit = jnp.sqrt(6.0 / (fan_in + fan_out))
        return jax.random.uniform(k, shape, jnp.float32, -limit, limit)

    ks = jax.random.split(key, 5)
    dims = [(node_feature_dim, hidden), (hidden, hidden), (hidden, hidden), (hidden, hidden)]
    params = {}
    for i, (din, dout) in enumerate(dims, start=1):
        params[f"w{i}"] = glorot(ks[i - 1], (din, dout))
        params[f"b{i}"] = jnp.zeros((1, dout), jnp.float32)
    params["lin_w_t"] = glorot(ks[4], (hidden, num_classes))
    params["lin_b"] = jnp.zeros((1, num_classes), jnp.float32)
    return params


if __name__ == "__main__":
    # Small synthetic molecule-graph batch:
    #   N=16 nodes, node_feature_dim=16, hidden_channels=32, num_classes=2, 2 graphs.
    key = jax.random.PRNGKey(0)
    k_x, k_p = jax.random.split(key)

    N, F_IN, HIDDEN, NUM_CLASSES, NUM_GRAPHS = 16, 16, 32, 2, 2

    x = jax.random.normal(k_x, (N, F_IN), jnp.float32)
    batch = jnp.array([0] * 8 + [1] * 8, dtype=jnp.int32)

    # Undirected chain inside each graph (both edge directions listed, PyG style).
    src_list, dst_list = [], []
    for g in range(NUM_GRAPHS):
        base = g * 8
        for i in range(7):
            src_list += [base + i, base + i + 1]
            dst_list += [base + i + 1, base + i]
    edge_index = jnp.array([src_list, dst_list], dtype=jnp.int32)  # [2, 28]

    params = init_params(k_p, F_IN, HIDDEN, NUM_CLASSES)

    out = gcn_forward(x, edge_index, batch, params, num_graphs=NUM_GRAPHS)
    out = jax.block_until_ready(out)

    assert out.shape == (NUM_GRAPHS, NUM_CLASSES)
    assert bool(jnp.all(jnp.isfinite(out)))

    # Validate bf16-MXU / f32-accumulate kernel against the f32 reference.
    ref = gcn_reference_f32(x, edge_index, batch, params, NUM_GRAPHS)
    assert bool(jnp.allclose(out, ref, atol=2e-1, rtol=2e-1)), (
        f"kernel/reference mismatch: max abs diff {float(jnp.max(jnp.abs(out - ref)))}")

    print("KERNEL_OK")
</pallas_src>

<mosaic_0001>
module attributes {stable_mosaic.version = 11 : i64} {
  func.func @gcn_kernel(%arg0: memref<16x16xbf16, #tpu.memory_space<vmem>>, %arg1: memref<16x16xbf16, #tpu.memory_space<vmem>>, %arg2: memref<16x32xbf16, #tpu.memory_space<vmem>>, %arg3: memref<1x32xf32, #tpu.memory_space<vmem>>, %arg4: memref<32x32xbf16, #tpu.memory_space<vmem>>, %arg5: memref<1x32xf32, #tpu.memory_space<vmem>>, %arg6: memref<32x32xbf16, #tpu.memory_space<vmem>>, %arg7: memref<1x32xf32, #tpu.memory_space<vmem>>, %arg8: memref<32x32xbf16, #tpu.memory_space<vmem>>, %arg9: memref<1x32xf32, #tpu.memory_space<vmem>>, %arg10: memref<2x16xbf16, #tpu.memory_space<vmem>>, %arg11: memref<32x2xbf16, #tpu.memory_space<vmem>>, %arg12: memref<1x2xf32, #tpu.memory_space<vmem>>, %arg13: memref<2x2xf32, #tpu.memory_space<vmem>>) attributes {dimension_semantics = [], scalar_prefetch = 0 : i64, scratch_operands = 0 : i64, tpu.core_type = #tpu.core_type<tc>} {
    %c0 = arith.constant 0 : index
    %c0_0 = arith.constant 0 : index
    %0 = vector.load %arg0[%c0, %c0_0] : memref<16x16xbf16, #tpu.memory_space<vmem>>, vector<16x16xbf16>
    %c0_1 = arith.constant 0 : index
    %c0_2 = arith.constant 0 : index
    %1 = vector.load %arg1[%c0_1, %c0_2] : memref<16x16xbf16, #tpu.memory_space<vmem>>, vector<16x16xbf16>
    %cst = arith.constant dense<0.000000e+00> : vector<16x16xf32>
    %2 = tpu.matmul %0, %1, %cst {dimension_numbers = #tpu.dot_dimension_numbers<[1], [0], [0], [1], [0, 0, 1, 1], [], []>} : vector<16x16xbf16>, vector<16x16xbf16>, vector<16x16xf32> -> vector<16x16xf32>
    %c0_3 = arith.constant 0 : index
    %c0_4 = arith.constant 0 : index
    %3 = vector.load %arg2[%c0_3, %c0_4] : memref<16x32xbf16, #tpu.memory_space<vmem>>, vector<16x32xbf16>
    %4 = arith.truncf %2 : vector<16x16xf32> to vector<16x16xbf16>
    %cst_5 = arith.constant dense<0.000000e+00> : vector<16x32xf32>
    %5 = tpu.matmul %4, %3, %cst_5 {dimension_numbers = #tpu.dot_dimension_numbers<[1], [0], [0], [1], [0, 0, 1, 1], [], []>} : vector<16x16xbf16>, vector<16x32xbf16>, vector<16x32xf32> -> vector<16x32xf32>
    %c0_6 = arith.constant 0 : index
    %c0_7 = arith.constant 0 : index
    %6 = vector.load %arg3[%c0_6, %c0_7] : memref<1x32xf32, #tpu.memory_space<vmem>>, vector<1x32xf32>
    %7 = vector.broadcast %6 : vector<1x32xf32> to vector<16x32xf32>
    %8 = arith.addf %5, %7 : vector<16x32xf32>
    %cst_8 = arith.constant 0.000000e+00 : f32
    %9 = vector.broadcast %cst_8 : f32 to vector<16x32xf32>
    %10 = arith.maximumf %8, %9 : vector<16x32xf32>
    %c0_9 = arith.constant 0 : index
    %c0_10 = arith.constant 0 : index
    %11 = vector.load %arg4[%c0_9, %c0_10] : memref<32x32xbf16, #tpu.memory_space<vmem>>, vector<32x32xbf16>
    %12 = arith.truncf %10 : vector<16x32xf32> to vector<16x32xbf16>
    %cst_11 = arith.constant dense<0.000000e+00> : vector<16x32xf32>
    %13 = tpu.matmul %12, %11, %cst_11 {dimension_numbers = #tpu.dot_dimension_numbers<[1], [0], [0], [1], [0, 0, 1, 1], [], []>} : vector<16x32xbf16>, vector<32x32xbf16>, vector<16x32xf32> -> vector<16x32xf32>
    %14 = arith.truncf %13 : vector<16x32xf32> to vector<16x32xbf16>
    %cst_12 = arith.constant dense<0.000000e+00> : vector<16x32xf32>
    %15 = tpu.matmul %0, %14, %cst_12 {dimension_numbers = #tpu.dot_dimension_numbers<[1], [0], [0], [1], [0, 0, 1, 1], [], []>} : vector<16x16xbf16>, vector<16x32xbf16>, vector<16x32xf32> -> vector<16x32xf32>
    %c0_13 = arith.constant 0 : index
    %c0_14 = arith.constant 0 : index
    %16 = vector.load %arg5[%c0_13, %c0_14] : memref<1x32xf32, #tpu.memory_space<vmem>>, vector<1x32xf32>
    %17 = vector.broadcast %16 : vector<1x32xf32> to vector<16x32xf32>
    %18 = arith.addf %15, %17 : vector<16x32xf32>
    %cst_15 = arith.constant 0.000000e+00 : f32
    %19 = vector.broadcast %cst_15 : f32 to vector<16x32xf32>
    %20 = arith.maximumf %18, %19 : vector<16x32xf32>
    %c0_16 = arith.constant 0 : index
    %c0_17 = arith.constant 0 : index
    %21 = vector.load %arg6[%c0_16, %c0_17] : memref<32x32xbf16, #tpu.memory_space<vmem>>, vector<32x32xbf16>
    %22 = arith.truncf %20 : vector<16x32xf32> to vector<16x32xbf16>
    %cst_18 = arith.constant dense<0.000000e+00> : vector<16x32xf32>
    %23 = tpu.matmul %22, %21, %cst_18 {dimension_numbers = #tpu.dot_dimension_numbers<[1], [0], [0], [1], [0, 0, 1, 1], [], []>} : vector<16x32xbf16>, vector<32x32xbf16>, vector<16x32xf32> -> vector<16x32xf32>
    %24 = arith.truncf %23 : vector<16x32xf32> to vector<16x32xbf16>
    %cst_19 = arith.constant dense<0.000000e+00> : vector<16x32xf32>
    %25 = tpu.matmul %0, %24, %cst_19 {dimension_numbers = #tpu.dot_dimension_numbers<[1], [0], [0], [1], [0, 0, 1, 1], [], []>} : vector<16x16xbf16>, vector<16x32xbf16>, vector<16x32xf32> -> vector<16x32xf32>
    %c0_20 = arith.constant 0 : index
    %c0_21 = arith.constant 0 : index
    %26 = vector.load %arg7[%c0_20, %c0_21] : memref<1x32xf32, #tpu.memory_space<vmem>>, vector<1x32xf32>
    %27 = vector.broadcast %26 : vector<1x32xf32> to vector<16x32xf32>
    %28 = arith.addf %25, %27 : vector<16x32xf32>
    %cst_22 = arith.constant 0.000000e+00 : f32
    %29 = vector.broadcast %cst_22 : f32 to vector<16x32xf32>
    %30 = arith.maximumf %28, %29 : vector<16x32xf32>
    %c0_23 = arith.constant 0 : index
    %c0_24 = arith.constant 0 : index
    %31 = vector.load %arg8[%c0_23, %c0_24] : memref<32x32xbf16, #tpu.memory_space<vmem>>, vector<32x32xbf16>
    %32 = arith.truncf %30 : vector<16x32xf32> to vector<16x32xbf16>
    %cst_25 = arith.constant dense<0.000000e+00> : vector<16x32xf32>
    %33 = tpu.matmul %32, %31, %cst_25 {dimension_numbers = #tpu.dot_dimension_numbers<[1], [0], [0], [1], [0, 0, 1, 1], [], []>} : vector<16x32xbf16>, vector<32x32xbf16>, vector<16x32xf32> -> vector<16x32xf32>
    %34 = arith.truncf %33 : vector<16x32xf32> to vector<16x32xbf16>
    %cst_26 = arith.constant dense<0.000000e+00> : vector<16x32xf32>
    %35 = tpu.matmul %0, %34, %cst_26 {dimension_numbers = #tpu.dot_dimension_numbers<[1], [0], [0], [1], [0, 0, 1, 1], [], []>} : vector<16x16xbf16>, vector<16x32xbf16>, vector<16x32xf32> -> vector<16x32xf32>
    %c0_27 = arith.constant 0 : index
    %c0_28 = arith.constant 0 : index
    %36 = vector.load %arg9[%c0_27, %c0_28] : memref<1x32xf32, #tpu.memory_space<vmem>>, vector<1x32xf32>
    %37 = vector.broadcast %36 : vector<1x32xf32> to vector<16x32xf32>
    %38 = arith.addf %35, %37 : vector<16x32xf32>
    %c0_29 = arith.constant 0 : index
    %c0_30 = arith.constant 0 : index
    %39 = vector.load %arg10[%c0_29, %c0_30] : memref<2x16xbf16, #tpu.memory_space<vmem>>, vector<2x16xbf16>
    %40 = arith.truncf %38 : vector<16x32xf32> to vector<16x32xbf16>
    %cst_31 = arith.constant dense<0.000000e+00> : vector<2x32xf32>
    %41 = tpu.matmul %39, %40, %cst_31 {dimension_numbers = #tpu.dot_dimension_numbers<[1], [0], [0], [1], [0, 0, 1, 1], [], []>} : vector<2x16xbf16>, vector<16x32xbf16>, vector<2x32xf32> -> vector<2x32xf32>
    %c0_32 = arith.constant 0 : index
    %c0_33 = arith.constant 0 : index
    %42 = vector.load %arg11[%c0_32, %c0_33] : memref<32x2xbf16, #tpu.memory_space<vmem>>, vector<32x2xbf16>
    %43 = arith.truncf %41 : vector<2x32xf32> to vector<2x32xbf16>
    %cst_34 = arith.constant dense<0.000000e+00> : vector<2x2xf32>
    %44 = tpu.matmul %43, %42, %cst_34 {dimension_numbers = #tpu.dot_dimension_numbers<[1], [0], [0], [1], [0, 0, 1, 1], [], []>} : vector<2x32xbf16>, vector<32x2xbf16>, vector<2x2xf32> -> vector<2x2xf32>
    %c0_35 = arith.constant 0 : index
    %c0_36 = arith.constant 0 : index
    %45 = vector.load %arg12[%c0_35, %c0_36] : memref<1x2xf32, #tpu.memory_space<vmem>>, vector<1x2xf32>
    %46 = vector.broadcast %45 : vector<1x2xf32> to vector<2x2xf32>
    %47 = arith.addf %44, %46 : vector<2x2xf32>
    %c0_37 = arith.constant 0 : index
    %c0_38 = arith.constant 0 : index
    %48 = vector.load %arg13[%c0_37, %c0_38] : memref<2x2xf32, #tpu.memory_space<vmem>>, vector<2x2xf32>
    tpu.vector_store %arg13[%c0_37, %c0_38], %47 {strides = array<i32>} : memref<2x2xf32, #tpu.memory_space<vmem>>, vector<2x2xf32>,
    return
  }
}

</mosaic_0001>

<bundles_post_ra>
// kernel: gcn_forward.1
= control target key start
LH: loop header
LB: loop body
LE: loop exit
PB: predicated region body
PF: predicated region fallthrough
CT: control target
= control target key end

     0   :  { %v785_v1 = vmov 0.0   ;;  %vm786_vm0 = vmmov 0   ;;  %vm61_vm1 = vcmask 130048   ;;  %s962_s0 = inlined_call_operand.vmem [shape: bf16[16,16], index: 0, kind: input, shape index: {}]   ;;  %s963_s1 = inlined_call_operand.vmem [shape: bf16[16,16], index: 1, kind: input, shape index: {}]   ;;  %s964_s2 = inlined_call_operand.vmem [shape: bf16[16,32], index: 2, kind: input, shape index: {}]   ;;  %s965_s3 = inlined_call_operand.vmem [shape: f32[1,32], index: 3, kind: input, shape index: {}]   ;;  %s966_s4 = inlined_call_operand.vmem [shape: bf16[32,32], index: 4, kind: input, shape index: {}]   ;;  %s967_s5 = inlined_call_operand.vmem [shape: f32[1,32], index: 5, kind: input, shape index: {}]   ;;  %s968_s6 = inlined_call_operand.vmem [shape: bf16[32,32], index: 6, kind: input, shape index: {}]   ;;  %s969_s7 = inlined_call_operand.vmem [shape: f32[1,32], index: 7, kind: input, shape index: {}]   ;;  %s970_s8 = inlined_call_operand.vmem [shape: bf16[32,32], index: 8, kind: input, shape index: {}]   ;;  %s971_s9 = inlined_call_operand.vmem [shape: f32[1,32], index: 9, kind: input, shape index: {}]   ;;  %s972_s10 = inlined_call_operand.vmem [shape: bf16[2,16], index: 10, kind: input, shape index: {}]   ;;  %s973_s11 = inlined_call_operand.vmem [shape: bf16[32,2], index: 11, kind: input, shape index: {}]   ;;  %s974_s12 = inlined_call_operand.vmem [shape: f32[1,2], index: 12, kind: input, shape index: {}]   ;;  %s975_s13 = inlined_call_operand.hbm [shape: f32[2,2], index: 13, kind: output, shape index: {}]  }
   0x1   :  { %v752_v0 = vld [vmem:[%s963_s1] sm:$0xff]   ;;  %681 = vmatprep.subr.bf16.mxu0 %v785_v1  ;;  %687 = vmatprep.subr.bf16.mxu1 %v785_v1 }
   0x2   :  { %v865_v2 = vld [vmem:[%s962_s0] sm:$0xff]   ;;  %682 = vmatpush3.bf16.msra.mxu0 %v752_v0  ;;  %683 = vmatprep.mubr.msk.bf16.mxu0 %vm786_vm0, %v785_v1 }
   0x3   :  { %689 = vmatprep.mubr.msk.bf16.mxu1 %vm786_vm0, %v785_v1  ;;  %693 = vmatprep.subr.bf16.mxu0 %v785_v1 }
   0x5   :  { %684 = vmatmul.mubr.msk.bf16.vlgmr.msra.gmra.mxu0 %vm61_vm1, %v865_v2 }
   0x6   :  { %697 = vmatprep.mubr.msk.bf16.mxu0 %vm786_vm0, %v785_v1 }
   0x7   :  { %18 = vsyncpa [#allocation3], 0  ;;  %v754_v3 = vld [vmem:[%s964_s2] sm:$0xff]   ;;  %v755_v9 = vld [vmem:[%s966_s4 + $0x8] sm:$0xff]   ;;  %vm185_vm2 = vcmask 261120   ;;  %s787_s30 = smov [#allocation2]  }
   0x8   :  { %688 = vmatpush3.bf16.msra.mxu1 %v754_v3  ;;  %694 = vmatpush3.bf16.msra.mxu0 %v755_v9  ;;  %v756_v10 = vld [vmem:[%s966_s4] sm:$0xff]   ;;  %v757_v26 = vld [vmem:[%s968_s6 + $0x8] sm:$0xff]   ;;  %vm615_vm3 = vcmask 9216  }
   0x9   :  { %701 = vmatprep.subr.bf16.mxu1 %v785_v1  ;;  %695 = vmatprep.subr.bf16.mxu0 %v785_v1  ;;  %v634_v11 = vld [vmem:[%s965_s3] ss:$0 sm:$0xff]  ;;  %v759_v43 = vld [vmem:[%s970_s8 + $0x8] sm:$0xff]  }
   0xa   :  { %v758_v27 = vld [vmem:[%s968_s6] sm:$0xff]   ;;  %v761_v60 = vld [vmem:[%s973_s11 + $0x8] sm:$0xff]  }
   0xb   :  { %v640_v28 = vld [vmem:[%s967_s5] ss:$0 sm:$0xff] }
   0xc   :  { %696 = vmatpush3.bf16.msra.mxu0 %v756_v10  ;;  %v760_v44 = vld [vmem:[%s970_s8] sm:$0xff]  }
   0xd   :  { %707 = vmatprep.subr.bf16.mxu0 %v785_v1  ;;  %v645_v45 = vld [vmem:[%s969_s7] ss:$0 sm:$0xff] }
   0xe   :  { %v650_v62 = vld [vmem:[%s971_s9] ss:$0 sm:$0xff] }
  0xc5   :  { %v99_v4 = vpop.f32.mrf.mxu0 }
  0xc7   :  { %v685_v5 = vpop.f32.mrf.mxu0 }
  0xc9   :  { %v102_v6 = vpop.f32.mrf.mxu0 }
  0xca   :  { %v108_v7 = vpack.c.bf16 %v102_v6, %v99_v4  ;;  %v503_v6 = vld [vmem:[%s972_s10] sm:$0x1]  ;;  %s623_s10 = sshll.u32 %s787_s30, 4  ;;  %s624_s10 = int_to_ptr.vmem [resolvable:$true] %s623_s10 }
  0xcb   :  { %v686_v8 = vpop.f32.mrf.mxu0  ;;  %p768_p1 = scmp.lt.s32.totalorder %s624_s10, %s624_s10 }
  0xcc   :  { %690 = vmatmul.mubr.msk.bf16.vlgmr.msra.gmra.mxu1 %vm61_vm1, %v108_v7 }
  0xcd   :  { %703 = vmatprep.mubr.msk.bf16.mxu1 %vm786_vm0, %v785_v1 }
 0x18c   :  { %v159_v12 = vpop.f32.mrf.mxu1 }
 0x18d   :  { %v160_v14 = vadd.f32 %v634_v11, %v159_v12  ;;  %v653_v12 = vld [vmem:[%s974_s12] ss:$0 sm:$0xff] }
 0x18e   :  { %v691_v13 = vpop.f32.mrf.mxu1 }
 0x18f   :  { %v166_v18 = vmax.f32 %v160_v14, 0.0 }
 0x190   :  { %v162_v15 = vpop.f32.mrf.mxu1 }
 0x191   :  { %v163_v16 = vadd.f32 %v634_v11, %v162_v15 }
 0x192   :  { %v692_v17 = vpop.f32.mrf.mxu1 }
 0x193   :  { %v167_v19 = vmax.f32 %v163_v16, 0.0 }
 0x195   :  { %v172_v20 = vpack.c.bf16 %v167_v19, %v166_v18 }
 0x197   :  { %698 = vmatmul.mubr.msk.bf16.vlgmr.msra.gmra.mxu0 %vm185_vm2, %v172_v20 }
 0x198   :  { %711 = vmatprep.mubr.msk.bf16.mxu0 %vm786_vm0, %v785_v1  ;;  %708 = vmatpush3.bf16.msra.mxu0 %v757_v26 }
 0x199   :  { %709 = vmatprep.subr.bf16.mxu0 %v785_v1 }
 0x19c   :  { %710 = vmatpush3.bf16.msra.mxu0 %v758_v27 }
 0x19d   :  { %721 = vmatprep.subr.bf16.mxu0 %v785_v1 }
 0x257   :  { %v223_v21 = vpop.f32.mrf.mxu0 }
 0x259   :  { %v699_v22 = vpop.f32.mrf.mxu0 }
 0x25b   :  { %v226_v23 = vpop.f32.mrf.mxu0 }
 0x25c   :  { %v230_v24 = vpack.c.bf16 %v226_v23, %v223_v21 }
 0x25d   :  { %v700_v25 = vpop.f32.mrf.mxu0 }
 0x25e   :  { %702 = vmatpush3.bf16.msra.mxu1 %v230_v24 }
 0x25f   :  { %715 = vmatprep.subr.bf16.mxu1 %v785_v1 }
 0x261   :  { %704 = vmatmul.mubr.msk.bf16.vlgmr.msra.gmra.mxu1 %vm61_vm1, %v865_v2 }
 0x262   :  { %717 = vmatprep.mubr.msk.bf16.mxu1 %vm786_vm0, %v785_v1 }
 0x321   :  { %v272_v29 = vpop.f32.mrf.mxu1 }
 0x322   :  { %v273_v31 = vadd.f32 %v640_v28, %v272_v29 }
 0x323   :  { %v705_v30 = vpop.f32.mrf.mxu1 }
 0x324   :  { %v279_v35 = vmax.f32 %v273_v31, 0.0 }
 0x325   :  { %v275_v32 = vpop.f32.mrf.mxu1 }
 0x326   :  { %v276_v33 = vadd.f32 %v640_v28, %v275_v32 }
 0x327   :  { %v706_v34 = vpop.f32.mrf.mxu1 }
 0x328   :  { %v280_v36 = vmax.f32 %v276_v33, 0.0 }
 0x32a   :  { %v285_v37 = vpack.c.bf16 %v280_v36, %v279_v35 }
 0x32c   :  { %712 = vmatmul.mubr.msk.bf16.vlgmr.msra.gmra.mxu0 %vm185_vm2, %v285_v37 }
 0x32d   :  { %725 = vmatprep.mubr.msk.bf16.mxu0 %vm786_vm0, %v785_v1  ;;  %722 = vmatpush3.bf16.msra.mxu0 %v759_v43 }
 0x32e   :  { %723 = vmatprep.subr.bf16.mxu0 %v785_v1 }
 0x331   :  { %724 = vmatpush3.bf16.msra.mxu0 %v760_v44 }
 0x332   :  { %735 = vmatprep.subr.bf16.mxu0 %v785_v1 }
 0x3ec   :  { %v335_v38 = vpop.f32.mrf.mxu0 }
 0x3ee   :  { %v713_v39 = vpop.f32.mrf.mxu0 }
 0x3f0   :  { %v338_v40 = vpop.f32.mrf.mxu0 }
 0x3f1   :  { %v342_v41 = vpack.c.bf16 %v338_v40, %v335_v38 }
 0x3f2   :  { %v714_v42 = vpop.f32.mrf.mxu0 }
 0x3f3   :  { %716 = vmatpush3.bf16.msra.mxu1 %v342_v41 }
 0x3f4   :  { %729 = vmatprep.subr.bf16.mxu1 %v785_v1 }
 0x3f6   :  { %718 = vmatmul.mubr.msk.bf16.vlgmr.msra.gmra.mxu1 %vm61_vm1, %v865_v2 }
 0x3f7   :  { %731 = vmatprep.mubr.msk.bf16.mxu1 %vm786_vm0, %v785_v1 }
 0x4b6   :  { %v384_v46 = vpop.f32.mrf.mxu1 }
 0x4b7   :  { %v385_v48 = vadd.f32 %v645_v45, %v384_v46 }
 0x4b8   :  { %v719_v47 = vpop.f32.mrf.mxu1 }
 0x4b9   :  { %v391_v52 = vmax.f32 %v385_v48, 0.0 }
 0x4ba   :  { %v387_v49 = vpop.f32.mrf.mxu1 }
 0x4bb   :  { %v388_v50 = vadd.f32 %v645_v45, %v387_v49 }
 0x4bc   :  { %v720_v51 = vpop.f32.mrf.mxu1 }
 0x4bd   :  { %v392_v53 = vmax.f32 %v388_v50, 0.0 }
 0x4bf   :  { %v397_v54 = vpack.c.bf16 %v392_v53, %v391_v52 }
 0x4c1   :  { %726 = vmatmul.mubr.msk.bf16.vlgmr.msra.gmra.mxu0 %vm185_vm2, %v397_v54 }
 0x4c2   :  { %737 = vmatprep.mubr.msk.bf16.mxu0 %vm786_vm0, %v785_v1 }
 0x581   :  { %v447_v55 = vpop.f32.mrf.mxu0 }
 0x583   :  { %v727_v56 = vpop.f32.mrf.mxu0 }
 0x585   :  { %v450_v57 = vpop.f32.mrf.mxu0 }
 0x586   :  { %v454_v58 = vpack.c.bf16 %v450_v57, %v447_v55 }
 0x587   :  { %v728_v59 = vpop.f32.mrf.mxu0 }
 0x588   :  { %730 = vmatpush3.bf16.msra.mxu1 %v454_v58 }
 0x589   :  { %741 = vmatprep.subr.bf16.mxu1 %v785_v1 }
 0x58b   :  { %732 = vmatmul.mubr.msk.bf16.vlgmr.msra.gmra.mxu1 %vm61_vm1, %v865_v2 }
 0x58c   :  { %745 = vmatprep.mubr.msk.bf16.mxu1 %vm786_vm0, %v785_v1  ;;  %742 = vmatpush3.bf16.msra.mxu1 %v761_v60 }
 0x58d   :  { %743 = vmatprep.subr.bf16.mxu1 %v785_v1  ;;  %v762_v1 = vld [vmem:[%s973_s11] sm:$0xff]   ;;  %s763_s11 = scalar_lea.vmem %s624_s10, 32 }
 0x58e   :  { %p764_p0 = scmp.ne.s32.totalorder %s624_s10, %s763_s11  ;;  %p769_p2 = scmp.lt.s32.totalorder %s763_s11, %s763_s11 }
 0x590   :  { %744 = vmatpush3.bf16.msra.mxu1 %v762_v1  ;;  %p770_p3 = por %p769_p2, %p768_p1 }
 0x592   :  { %p771_p4 = pnand %p770_p3, %p764_p0 }
 0x64b   :  { %v496_v61 = vpop.f32.mrf.mxu1 }
 0x64c   :  { %v497_v3 = vadd.f32 %v650_v62, %v496_v61 }
 0x64d   :  { %v733_v63 = vpop.f32.mrf.mxu1 }
 0x64f   :  { %v499_v0 = vpop.f32.mrf.mxu1 }
 0x650   :  { %v500_v4 = vadd.f32 %v650_v62, %v499_v0 }
 0x651   :  { %v734_v2 = vpop.f32.mrf.mxu1 }
 0x652   :  { %v504_v5 = vpack.c.bf16 %v500_v4, %v497_v3 }
 0x654   :  { %736 = vmatpush3.bf16.msra.mxu0 %v504_v5 }
 0x657   :  { %738 = vmatmul.mubr.msk.bf16.vlgmr.msra.gmra.mxu0 %vm61_vm1, %v503_v6 }
 0x717   :  { %v542_v7 = vpop.f32.mrf.mxu0 }
 0x718   :  { %v552_v8 = vpack.c.bf16 %v542_v7, %v542_v7 }
 0x719   :  { %v739_v9 = vpop.f32.mrf.mxu0 }
 0x71a   :  { %746 = vmatmul.mubr.msk.bf16.vlgmr.msra.gmra.mxu1 %vm185_vm2, %v552_v8 }
 0x71b   :  { %v545_v10 = vpop.f32.mrf.mxu0 }
 0x71d   :  { %v740_v11 = vpop.f32.mrf.mxu0 }
 0x7da   :  { %v609_v13 = vpop.f32.mrf.mxu1 }
 0x7db   :  { %v610_v14 = vadd.f32 %v653_v12, %v609_v13 }
 0x7dc   :  { %v747_v15 = vpop.f32.mrf.mxu1 }
 0x7dd   :  { %616 = vst.msk [vmem:[#allocation2] sm:$0x3] %vm615_vm3, %v610_v14 }
 0x7de   :  { %v612_v16 = vpop.f32.mrf.mxu1 }
 0x7df   :  { %774 = shalt.err (!%p771_p4)
}
 0x7e0   :  { %626 = dma.vmem_to_hbm [thread:$0]  %s624_s10, 32, %s975_s13, [#allocation3]   ;;  %v748_v17 = vpop.f32.mrf.mxu1 }
 0x7e1   :  { %783 = dma.done.wait [#allocation3], 32  }
 0x7e2   :  { %784 = vsyncadd [#allocation3], 4294967264 }
 0x7e3   :  { %630 = vsyncpa [#allocation3], 1 }

</bundles_post_ra>
